<compile_context>
chip_gen: v6e
topology: v6e:2x2x1
jax: 0.10.0
libtpu: 0.0.40
codegen_flags: <defaults>
</compile_context>

<pallas_src>
import functools
import math

import jax
import jax.numpy as jnp
from jax.experimental import pallas as pl
from jax.experimental.pallas import tpu as pltpu

_LANES = 128
_LOG_LO = math.log(1e-6)
_LOG_HI = math.log(1.0 - 1e-6)


def _ce_loss_kernel(p_ref, t_ref, o_ref, acc_ref, *, hw, num_t, n_inner,
                    need_mask, has_skip):
    """One (1, C, tg, 128) tile: softmax over C, BCE vs target, accumulate partials."""
    o = pl.program_id(1)
    i = pl.program_id(2)
    t = o * n_inner + i                      # global tile index along G
    _, C, tg, lanes = p_ref.shape

    @pl.when(i == 0)
    def _():
        acc_ref[...] = jnp.zeros_like(acc_ref)

    def fold_and_accumulate(x):
        # vreg-shaped accumulation: fold the tg sublane rows into (C, 8, 128) with a
        # short tree of elementwise VPU adds; no cross-lane/sublane XLU reduce in the
        # steady state.
        if tg % 8 == 0 and tg > 8:
            chunks = [x[:, g * 8:(g + 1) * 8, :] for g in range(tg // 8)]
            while len(chunks) > 1:
                nxt = [a + b for a, b in zip(chunks[0::2], chunks[1::2])]
                if len(chunks) % 2:
                    nxt.append(chunks[-1])
                chunks = nxt
            part = chunks[0]                              # (C, 8, 128)
        else:
            part = x                                      # (C, tg, 128), tiny-G case
        acc_ref[...] += part

    def compute():
        logits = p_ref[0].astype(jnp.float32)             # (C, tg, 128)
        tgt = t_ref[0].astype(jnp.float32)                 # (C, tg, 128)

        # Numerically-stable softmax over the channel axis (axis 0). Reducing over the
        # leading (non-tiled) axis is elementwise max/add across C (tg,128) slabs: VPU.
        m = jnp.max(logits, axis=0, keepdims=True)          # (1, tg, 128)
        shifted = logits - m
        e = jnp.exp(shifted)                                 # 1 exp / element (EUP)
        s = jnp.sum(e, axis=0, keepdims=True)                # (1, tg, 128)
        inv_s = pl.reciprocal(s, approx=True)                # EUP, 1/C of elements

        # log(clamp(p)) == clip(log p, log 1e-6, log(1-1e-6)) since log is monotonic,
        # so no second per-element log for log_p; log(s)/1/s touch only 1/C of elements.
        log_p = jnp.clip(shifted - jnp.log(s), _LOG_LO, _LOG_HI)
        prob = jnp.clip(e * inv_s, 1e-6, 1.0 - 1e-6)         # clamp(softmax) semantics
        log_1mp = jnp.log(1.0 - prob)                        # 1 log / element (EUP)

        # Fused BCE combine (+t*log p + (1-t)*log(1-p)); the negation, channel weight /
        # ignore_index, and the shared 1/(N*H*W) are applied once in the wrapper.
        pos = log_1mp + tgt * (log_p - log_1mp)              # (C, tg, 128), VPU

        if need_mask:
            # Only the globally-last tile can contain spatial padding or undefined
            # partial-block data, so the iota/compare/select never runs in steady state.
            @pl.when(t == num_t - 1)
            def _():
                row = jax.lax.broadcasted_iota(jnp.int32, (tg, lanes), 0)
                lane = jax.lax.broadcasted_iota(jnp.int32, (tg, lanes), 1)
                flat = (t * tg + row) * lanes + lane
                # select (not arithmetic masking): padded lanes may hold inf/NaN.
                fold_and_accumulate(jnp.where((flat < hw)[None, :, :], pos, 0.0))

            @pl.when(t != num_t - 1)
            def _():
                fold_and_accumulate(pos)
        else:
            fold_and_accumulate(pos)

    if has_skip:
        # Rectangular (n_outer, n_inner) grid may overhang num_t by one step.
        pl.when(t < num_t)(compute)
    else:
        compute()

    @pl.when(i == n_inner - 1)
    def _():
        # Single cross-sublane reduce per (image, outer chunk), outside steady state.
        o_ref[0, 0] = jnp.sum(acc_ref[...], axis=1)          # (C, 128)


def ce_loss(predict, target, weight=None, ignore_index=None, *, tg=None,
            work_bytes=8 * 1024 * 1024):
    """Pallas implementation of CELoss.forward(predict, target) for NCHW inputs."""
    assert predict.shape == target.shape, "predict & target shape do not match"
    N, C, H, W = predict.shape
    HW = H * W

    # (N, C, H, W) -> (N, C, G, 128): a free, contiguous reshape when H*W % 128 == 0.
    hw_pad = ((HW + _LANES - 1) // _LANES) * _LANES
    G = hw_pad // _LANES
    p3 = predict.reshape(N, C, HW)
    t3 = target.reshape(N, C, HW)
    if hw_pad != HW:
        # TODO(synk): ragged H*W costs one extra HBM pass over both tensors (the pad);
        # avoiding it would need a C-on-sublanes layout (bad for small C) or a prefix
        # slice that XLA copies anyway, so only the mask (last tile) is done in-kernel.
        p3 = jnp.pad(p3, ((0, 0), (0, 0), (0, hw_pad - HW)))
        t3 = jnp.pad(t3, ((0, 0), (0, 0), (0, hw_pad - HW)))
    p4 = p3.reshape(N, C, G, _LANES)
    t4 = t3.reshape(N, C, G, _LANES)

    # Tile rows along G sized from the f32 in-kernel working set (~6 live (C,tg,128)
    # f32 temporaries), independent of the input dtype, hard-capped at 512 rows:
    # measured tiling data shows ~512 rows already sits at the HBM roofline, and the
    # small block keeps double-buffered inputs + temporaries well inside v7x's 64 MiB.
    if tg is None:
        ws_row_bytes = 6 * C * _LANES * 4
        tg_cap = max(8, min(512, (work_bytes // ws_row_bytes) // 8 * 8))
        tg = G if G <= tg_cap else tg_cap
    else:
        tg = min(tg, G)
        assert tg == G or tg % 8 == 0, "explicit tg must be a multiple of 8"
    num_t = (G + tg - 1) // tg
    need_mask = (hw_pad != HW) or (G % tg != 0)
    acc_rows = 8 if tg % 8 == 0 else tg

    # Megacore: N is the natural parallel axis; when N == 1 (common for inference),
    # split the tile axis into (outer "parallel", inner "arbitrary") so both v7x
    # TensorCores get work.  The single possible overhanging grid step is clamped in
    # the index_map and skipped in-kernel.  On 1-TC chips (v5e/v6e) this is a no-op.
    n_outer = 2 if (N == 1 and num_t >= 2) else 1
    n_inner = -(-num_t // n_outer)
    has_skip = n_outer * n_inner != num_t
    assert (n_outer - 1) * n_inner < num_t  # reset tile (i==0) always in range

    if has_skip:
        def tile_idx(n, o, i):
            return (n, 0, jnp.minimum(o * n_inner + i, num_t - 1), 0)
    else:
        def tile_idx(n, o, i):
            return (n, 0, o * n_inner + i, 0)

    kernel = functools.partial(_ce_loss_kernel, hw=HW, num_t=num_t, n_inner=n_inner,
                               need_mask=need_mask, has_skip=has_skip)

    partials = pl.pallas_call(
        kernel,
        out_shape=jax.ShapeDtypeStruct((N, n_outer, C, _LANES), jnp.float32),
        grid_spec=pltpu.PrefetchScalarGridSpec(
            num_scalar_prefetch=0,
            grid=(N, n_outer, n_inner),
            in_specs=[
                pl.BlockSpec((1, C, tg, _LANES), tile_idx),
                pl.BlockSpec((1, C, tg, _LANES), tile_idx),
            ],
            out_specs=pl.BlockSpec((1, 1, C, _LANES), lambda n, o, i: (n, o, 0, 0)),
            scratch_shapes=[pltpu.VMEM((C, acc_rows, _LANES), jnp.float32)],
        ),
        compiler_params=pltpu.CompilerParams(
            dimension_semantics=("parallel", "parallel", "arbitrary"),
            vmem_limit_bytes=32 * 1024 * 1024,
        ),
    )(p4, t4)

    # Per-channel weight (also encodes ignore_index), the BCE negation, and the shared
    # 1/(N*H*W) mean are applied once here, outside the hot loop.
    if weight is None:
        w = jnp.ones((C,), jnp.float32)
    else:
        w = jnp.asarray(weight, jnp.float32)
        assert w.shape == (C,)
    if ignore_index is not None and 0 <= ignore_index < C:
        w = w.at[ignore_index].set(0.0)

    per_channel = jnp.sum(partials, axis=(0, 1, 3))          # (C,)
    return -jnp.sum(per_channel * w) / jnp.float32(N * HW)


def ce_loss_ref(predict, target, weight=None, ignore_index=None):
    """Pure-JAX reference matching the PyTorch module."""
    prob = jax.nn.softmax(predict.astype(jnp.float32), axis=1)
    prob = jnp.clip(prob, 1e-6, 1.0 - 1e-6)
    tgt = target.astype(jnp.float32)
    C = predict.shape[1]
    total = jnp.float32(0.0)
    for i in range(C):
        if ignore_index is not None and i == ignore_index:
            continue
        p = prob[:, i].reshape(prob.shape[0], -1)
        t = tgt[:, i].reshape(tgt.shape[0], -1)
        loss = -(t * jnp.log(p) + (1 - t) * jnp.log(1 - p))
        loss = jnp.sum(loss) / loss.size
        if weight is not None:
            loss = loss * weight[i]
        total = total + loss
    return total


if __name__ == "__main__":
    key = jax.random.PRNGKey(0)
    k1, k2, k3, k4, k5, k6, k7, k8 = jax.random.split(key, 8)
    RTOL, ATOL = 2e-3, 5e-4   # approx-reciprocal softmax denominator in the kernel

    # 1) Basic NCHW case (single tile, no mask, N>=2 so no outer split).
    N, C, H, W = 2, 4, 16, 16
    predict = jax.random.normal(k1, (N, C, H, W), dtype=jnp.float32)
    target = jax.random.uniform(k2, (N, C, H, W), dtype=jnp.float32)   # soft targets
    out = jax.block_until_ready(ce_loss(predict, target))
    ref = ce_loss_ref(predict, target)
    assert jnp.allclose(out, ref, rtol=RTOL, atol=ATOL), (out, ref)

    # 2) Per-channel weight + ignore_index, N=1 (exercises the outer "parallel" split)
    #    with a partial last tile (exercises the last-tile-only mask) via explicit tg.
    N2, C2, H2, W2 = 1, 4, 24, 64            # H*W = 1536 -> G = 12, tg = 8 -> 2 tiles
    p2 = jax.random.normal(k3, (N2, C2, H2, W2), dtype=jnp.float32)
    t2 = jax.random.uniform(k4, (N2, C2, H2, W2), dtype=jnp.float32)
    wgt = jnp.array([0.5, 2.0, 1.0, 0.25], dtype=jnp.float32)
    out2 = jax.block_until_ready(ce_loss(p2, t2, weight=wgt, ignore_index=2, tg=8))
    ref2 = ce_loss_ref(p2, t2, weight=wgt, ignore_index=2)
    assert jnp.allclose(out2, ref2, rtol=RTOL, atol=ATOL), (out2, ref2)

    # 3) bf16 inputs (halves HBM traffic on v5e/v6e); kernel upcasts internally.
    out3 = jax.block_until_ready(
        ce_loss(p2.astype(jnp.bfloat16), t2.astype(jnp.bfloat16)))
    ref3 = ce_loss_ref(p2.astype(jnp.bfloat16), t2.astype(jnp.bfloat16))
    assert jnp.allclose(out3, ref3, rtol=RTOL, atol=ATOL), (out3, ref3)

    # 4) N=1 with an odd tile count (exercises the clamped index_map + in-kernel skip
    #    of the overhanging grid step of the outer split).
    N4, C4, H4, W4 = 1, 4, 24, 128            # H*W = 3072 -> G = 24, tg = 8 -> 3 tiles
    p4_ = jax.random.normal(k5, (N4, C4, H4, W4), dtype=jnp.float32)
    t4_ = jax.random.uniform(k6, (N4, C4, H4, W4), dtype=jnp.float32)
    out4 = jax.block_until_ready(ce_loss(p4_, t4_, tg=8))
    ref4 = ce_loss_ref(p4_, t4_)
    assert jnp.allclose(out4, ref4, rtol=RTOL, atol=ATOL), (out4, ref4)

    # 5) Ragged H*W (not a multiple of 128): pad path + last-tile mask.
    N5, C5, H5, W5 = 2, 3, 10, 30             # H*W = 300 -> padded to 384
    p5 = jax.random.normal(k7, (N5, C5, H5, W5), dtype=jnp.float32)
    t5 = jax.random.uniform(k8, (N5, C5, H5, W5), dtype=jnp.float32)
    out5 = jax.block_until_ready(ce_loss(p5, t5))
    ref5 = ce_loss_ref(p5, t5)
    assert jnp.allclose(out5, ref5, rtol=RTOL, atol=ATOL), (out5, ref5)

    print("KERNEL_OK")
</pallas_src>

<mosaic_0001>
module attributes {stable_mosaic.version = 11 : i64} {
  func.func @_ce_loss_kernel(%arg0: i32, %arg1: i32, %arg2: i32, %arg3: memref<1x4x2x128xf32, #tpu.memory_space<vmem>>, %arg4: memref<1x4x2x128xf32, #tpu.memory_space<vmem>>, %arg5: memref<1x1x4x128xf32, #tpu.memory_space<vmem>>, %arg6: memref<4x2x128xf32, #tpu.memory_space<vmem>>) attributes {dimension_semantics = [#tpu.dimension_semantics<parallel>, #tpu.dimension_semantics<parallel>, #tpu.dimension_semantics<arbitrary>], iteration_bounds = array<i64: 2, 1, 1>, scalar_prefetch = 0 : i64, scratch_operands = 1 : i64, tpu.core_type = #tpu.core_type<tc>, window_params = [{transform_indices = @transform_0, window_bounds = array<i64: 1, 4, 2, 128>}, {transform_indices = @transform_1, window_bounds = array<i64: 1, 4, 2, 128>}, {transform_indices = @transform_2, window_bounds = array<i64: 1, 1, 4, 128>}]} {
    %c0_i32 = arith.constant 0 : i32
    %0 = arith.cmpi eq, %arg2, %c0_i32 : i32
    %1 = arith.extui %0 : i1 to i32
    %c0_i32_0 = arith.constant 0 : i32
    %2 = arith.cmpi ne, %1, %c0_i32_0 : i32
    scf.if %2 {
      %cst_22 = arith.constant 0.000000e+00 : f32
      %40 = vector.broadcast %cst_22 : f32 to vector<4x2x128xf32>
      %c0_23 = arith.constant 0 : index
      %c0_24 = arith.constant 0 : index
      %c0_25 = arith.constant 0 : index
      %41 = vector.load %arg6[%c0_23, %c0_24, %c0_25] : memref<4x2x128xf32, #tpu.memory_space<vmem>>, vector<4x2x128xf32>
      tpu.vector_store %arg6[%c0_23, %c0_24, %c0_25], %40 {strides = array<i32>} : memref<4x2x128xf32, #tpu.memory_space<vmem>>, vector<4x2x128xf32>,
    } else {
    }
    %c0 = arith.constant 0 : index
    %c0_1 = arith.constant 0 : index
    %c0_2 = arith.constant 0 : index
    %c0_3 = arith.constant 0 : index
    %3 = vector.load %arg3[%c0, %c0_1, %c0_2, %c0_3] : memref<1x4x2x128xf32, #tpu.memory_space<vmem>>, vector<1x4x2x128xf32>
    %4 = vector.shape_cast %3 : vector<1x4x2x128xf32> to vector<4x2x128xf32>
    %c0_4 = arith.constant 0 : index
    %c0_5 = arith.constant 0 : index
    %c0_6 = arith.constant 0 : index
    %c0_7 = arith.constant 0 : index
    %5 = vector.load %arg4[%c0_4, %c0_5, %c0_6, %c0_7] : memref<1x4x2x128xf32, #tpu.memory_space<vmem>>, vector<1x4x2x128xf32>
    %6 = vector.shape_cast %5 : vector<1x4x2x128xf32> to vector<4x2x128xf32>
    %cst = arith.constant dense<0xFF800000> : vector<2x128xf32>
    %7 = vector.multi_reduction <maximumf>, %4, %cst [0] : vector<4x2x128xf32> to vector<2x128xf32>
    %8 = vector.shape_cast %7 : vector<2x128xf32> to vector<1x2x128xf32>
    %9 = vector.broadcast %8 : vector<1x2x128xf32> to vector<4x2x128xf32>
    %10 = arith.subf %4, %9 : vector<4x2x128xf32>
    %11 = math.exp %10 : vector<4x2x128xf32>
    %cst_8 = arith.constant dense<0.000000e+00> : vector<2x128xf32>
    %12 = vector.multi_reduction <add>, %11, %cst_8 [0] : vector<4x2x128xf32> to vector<2x128xf32>
    %13 = vector.shape_cast %12 : vector<2x128xf32> to vector<1x2x128xf32>
    %14 = tpu.reciprocal %13 {approx = true} : vector<1x2x128xf32> -> vector<1x2x128xf32>
    %15 = math.log %13 : vector<1x2x128xf32>
    %16 = vector.broadcast %15 : vector<1x2x128xf32> to vector<4x2x128xf32>
    %17 = arith.subf %10, %16 : vector<4x2x128xf32>
    %cst_9 = arith.constant -13.8155107 : f32
    %cst_10 = arith.constant -1.00000045E-6 : f32
    %18 = vector.broadcast %cst_9 : f32 to vector<4x2x128xf32>
    %19 = arith.maximumf %18, %17 : vector<4x2x128xf32>
    %20 = vector.broadcast %cst_10 : f32 to vector<4x2x128xf32>
    %21 = arith.minimumf %20, %19 : vector<4x2x128xf32>
    %22 = vector.broadcast %14 : vector<1x2x128xf32> to vector<4x2x128xf32>
    %23 = arith.mulf %11, %22 : vector<4x2x128xf32>
    %cst_11 = arith.constant 9.99999997E-7 : f32
    %cst_12 = arith.constant 0.999998986 : f32
    %24 = vector.broadcast %cst_11 : f32 to vector<4x2x128xf32>
    %25 = arith.maximumf %24, %23 : vector<4x2x128xf32>
    %26 = vector.broadcast %cst_12 : f32 to vector<4x2x128xf32>
    %27 = arith.minimumf %26, %25 : vector<4x2x128xf32>
    %cst_13 = arith.constant 1.000000e+00 : f32
    %28 = vector.broadcast %cst_13 : f32 to vector<4x2x128xf32>
    %29 = arith.subf %28, %27 : vector<4x2x128xf32>
    %30 = math.log %29 : vector<4x2x128xf32>
    %31 = arith.subf %21, %30 : vector<4x2x128xf32>
    %32 = arith.mulf %6, %31 : vector<4x2x128xf32>
    %33 = arith.addf %30, %32 : vector<4x2x128xf32>
    %c0_14 = arith.constant 0 : index
    %c0_15 = arith.constant 0 : index
    %c0_16 = arith.constant 0 : index
    %34 = vector.load %arg6[%c0_14, %c0_15, %c0_16] : memref<4x2x128xf32, #tpu.memory_space<vmem>>, vector<4x2x128xf32>
    %35 = arith.addf %34, %33 : vector<4x2x128xf32>
    %c0_17 = arith.constant 0 : index
    %c0_18 = arith.constant 0 : index
    %c0_19 = arith.constant 0 : index
    %36 = vector.load %arg6[%c0_17, %c0_18, %c0_19] : memref<4x2x128xf32, #tpu.memory_space<vmem>>, vector<4x2x128xf32>
    tpu.vector_store %arg6[%c0_17, %c0_18, %c0_19], %35 {strides = array<i32>} : memref<4x2x128xf32, #tpu.memory_space<vmem>>, vector<4x2x128xf32>,
    %c0_i32_20 = arith.constant 0 : i32
    %37 = arith.cmpi eq, %arg2, %c0_i32_20 : i32
    %38 = arith.extui %37 : i1 to i32
    %c0_i32_21 = arith.constant 0 : i32
    %39 = arith.cmpi ne, %38, %c0_i32_21 : i32
    scf.if %39 {
      %c0_22 = arith.constant 0 : index
      %c0_23 = arith.constant 0 : index
      %c0_24 = arith.constant 0 : index
      %40 = vector.load %arg6[%c0_22, %c0_23, %c0_24] : memref<4x2x128xf32, #tpu.memory_space<vmem>>, vector<4x2x128xf32>
      %cst_25 = arith.constant dense<0.000000e+00> : vector<4x128xf32>
      %41 = vector.multi_reduction <add>, %40, %cst_25 [1] : vector<4x2x128xf32> to vector<4x128xf32>
      %c0_26 = arith.constant 0 : index
      %c0_27 = arith.constant 0 : index
      %c0_28 = arith.constant 0 : index
      %c0_29 = arith.constant 0 : index
      %42 = vector.load %arg5[%c0_26, %c0_27, %c0_28, %c0_29] : memref<1x1x4x128xf32, #tpu.memory_space<vmem>>, vector<1x1x4x128xf32>
      %43 = vector.shape_cast %42 : vector<1x1x4x128xf32> to vector<4x128xf32>
      %44 = vector.shape_cast %41 : vector<4x128xf32> to vector<1x1x4x128xf32>
      tpu.vector_store %arg5[%c0_26, %c0_27, %c0_28, %c0_29], %44 {strides = array<i32>} : memref<1x1x4x128xf32, #tpu.memory_space<vmem>>, vector<1x1x4x128xf32>,
    } else {
    }
    return
  }
  func.func @transform_0(%arg0: i32, %arg1: i32, %arg2: i32) -> (i32, i32, i32, i32) {
    %c1_i32 = arith.constant 1 : i32
    %0 = arith.muli %arg1, %c1_i32 : i32
    %1 = arith.addi %0, %arg2 : i32
    %c0_i32 = arith.constant 0 : i32
    %c0_i32_0 = arith.constant 0 : i32
    %c0_i32_1 = arith.constant 0 : i32
    return %arg0, %c0_i32, %1, %c0_i32_0 : i32, i32, i32, i32
  }
  func.func @transform_1(%arg0: i32, %arg1: i32, %arg2: i32) -> (i32, i32, i32, i32) {
    %c1_i32 = arith.constant 1 : i32
    %0 = arith.muli %arg1, %c1_i32 : i32
    %1 = arith.addi %0, %arg2 : i32
    %c0_i32 = arith.constant 0 : i32
    %c0_i32_0 = arith.constant 0 : i32
    %c0_i32_1 = arith.constant 0 : i32
    return %arg0, %c0_i32, %1, %c0_i32_0 : i32, i32, i32, i32
  }
  func.func @transform_2(%arg0: i32, %arg1: i32, %arg2: i32) -> (i32, i32, i32, i32) {
    %c0_i32 = arith.constant 0 : i32
    %c0_i32_0 = arith.constant 0 : i32
    %c0_i32_1 = arith.constant 0 : i32
    return %arg0, %arg1, %c0_i32, %c0_i32_0 : i32, i32, i32, i32
  }
}

</mosaic_0001>

<bundles_post_ra>
// kernel: tpu_custom_call.1
= control target key start
LH: loop header
LB: loop body
LE: loop exit
PB: predicated region body
PF: predicated region fallthrough
CT: control target
= control target key end

     0   :  { %7 = vsyncpa [#allocation4], 0  ;;  %s981_s0 = inlined_call_operand.hbm [shape: f32[2,4,2,128], index: 0, kind: input, shape index: {}]   ;;  %s982_s1 = inlined_call_operand.hbm [shape: f32[2,4,2,128], index: 1, kind: input, shape index: {}]   ;;  %s983_s2 = inlined_call_operand.hbm [shape: f32[2,1,4,128], index: 2, kind: output, shape index: {}]  }
   0x1   :  { %9 = vsyncpa [#allocation4 + $0x1], 0 }
   0x2   :  { %10 = vsyncpa [#allocation7], 0 }
   0x3   :  { %12 = vsyncpa [#allocation7 + $0x1], 0 }
   0x4   :  { %13 = vsyncpa [#allocation5], 0 }
   0x5   :  { %15 = vsyncpa [#allocation5 + $0x1], 0  ;;  %s789_s9 = smov 0   ;;  %s791_s10 = smov 0  }
   0x6   :  { %s793_s11 = smov 0   ;;  %s795_s12 = smov 0  }
   0x7   :  { %s797_s13 = smov 0   ;;  %s799_s14 = smov 0  }
   0x8 LB: > { %s516_s15 = sadd.s32 4294967295, %s766_s14   ;;  %s517_s16 = sadd.s32 4294967294, %s766_s14   ;;  %s766_s14 = sphi %s799_s14, %s21_s14   ;;  %s762_s13 = sphi %s797_s13, %s995_s13   ;;  %s758_s12 = sphi %s795_s12, %s994_s12   ;;  %s754_s11 = sphi %s793_s11, %s993_s11   ;;  %s750_s10 = sphi %s791_s10, %s992_s10   ;;  %s746_s9 = sphi %s789_s9, %s991_s9  }
   0x9   : > { %s40_s17 = sadd.s32 1, %s762_s13  ;;  %s51_s18 = sadd.s32 1, %s754_s11 }
   0xa   : > { %p42_p0 = scmp.ge.s32.totalorder %s40_s17, 2  ;;  %p58_p1 = scmp.ne.s32.totalorder %s754_s11, %s750_s10 }
   0xb   : > { %p59_p2 = scmp.eq.s32.totalorder %s766_s14, 0  ;;  %p64_p3 = scmp.ne.s32.totalorder %s750_s10, %s746_s9 }
   0xc   : > { %s997_s17 = smov (%p42_p0, %s40_s17), 0  ;;  %p65_p5 = scmp.eq.s32.totalorder %s516_s15, 0 }
   0xd   : > { %p830_p4 = por %p59_p2, %p58_p1  ;;  %s46_s20 = ssub.s32 %s762_s13, %s997_s17 }
   0xe   : > { %p120_p6 = scmp.eq.s32.totalorder %s516_s15, 1  ;;  %p49_p7 = scmp.eq.s32.totalorder %s46_s20, 0 }
   0xf   : > { %p836_p8 = por %p65_p5, %p64_p3  ;;  %p126_p10 = scmp.eq.s32.totalorder %s517_s16, 1 }
  0x10   : > { %p840_p9 = por %p120_p6, %p58_p1  ;;  %p553_p13 = scmp.lt.s32.totalorder %s766_s14, 2 }
  0x11   : > { %s845_s23 = scalar_select %p49_p7, %s754_s11, %s51_s18  }
  0x12   : > { %p847_p11 = por %p126_p10, %p64_p3  ;;  %s854_s25 = sand.u32 1, %s754_s11  }
  0x13   : > { %s520_s26 = sshll.u32 %s854_s25, 3  ;;  %s534_s27 = sshll.u32 %s762_s13, 7 }
  0x14   : > { %s158_s30 = scalar_lea.hbm %s981_s0, %s534_s27  ;;  %s150_s3 = scalar_lea.vmem [#allocation3], %s520_s26 }
  0x15   : > { %s159_s4 = sshll.u32 %s150_s3, 4  ;;  %p867_p0 = pnand %p553_p13, %p830_p4  ;;  %s160_s4 = int_to_ptr.vmem [resolvable:$true] %s159_s4 }
  0x16   : > { %p526_p1 = scmp.ge.s32.totalorder %s766_s14, 1  ;;  %s147_s6 = scalar_lea.sflag [#allocation4], %s854_s25 }
  0x17   : > { %p628_p2 = pneg %p867_p0  ;;  %s639_s7 = scalar_lea.vmem %s160_s4, 128 }
  0x18   : > { %p640_p3 = scmp.ne.s32.totalorder %s160_s4, %s639_s7  ;;  %s768_s8 = smov [#allocation3]  }
  0x19   : > { %s644_s15 = sshll.u32 %s768_s8, 4  ;;  %s645_s15 = int_to_ptr.vmem [resolvable:$false] %s644_s15 }
  0x1a   : > { %p642_p5 = pnand %p640_p3, %p628_p2  ;;  %s646_s16 = scalar_lea.vmem %s645_s15, 256 }
  0x1b   : > { %p647_p4 = scmp.lt.s32.totalorder %s160_s4, %s645_s15  ;;  %p648_p7 = scmp.lt.s32.totalorder %s646_s16, %s639_s7 }
  0x1c   : > { %p643_p6 = pneg %p642_p5 }
  0x1d   : > { %p649_p10 = por %p648_p7, %p647_p4 }
  0x1f   : > { %p650_p13 = pnand %p649_p10, %p643_p6 }
  0x21   : > { %653 = shalt.err (!%p650_p13)
}
  0x22   : > { %s769_s18 = smov 32   ;;  %s770_s19 = smov 2  }
  0x23   : > { %545 = dma.hbm_to_vmem [thread:$0]  (!%p867_p0), %s158_s30, 128, %s160_s4, %s147_s6, %s769_s18, %s769_s18, %s770_s19  }
  0x24   : > { %p190_p3 = scmp.lt.s32.totalorder %s766_s14, 3  ;;  %s181_s29 = scalar_lea.hbm %s982_s1, %s534_s27 }
  0x25   : > { %s173_s7 = scalar_lea.vmem [#allocation6], %s520_s26  ;;  %s170_s15 = scalar_lea.sflag [#allocation7], %s854_s25 }
  0x26   : > { %p888_p5 = pnand %p526_p1, %p190_p3  ;;  %s182_s8 = sshll.u32 %s173_s7, 4  ;;  %s183_s8 = int_to_ptr.vmem [resolvable:$true] %s182_s8 }
  0x27   : > { %s667_s16 = scalar_lea.vmem %s183_s8, 128  ;;  %s771_s30 = smov [#allocation6]  }
  0x28   : > { %p668_p6 = scmp.ne.s32.totalorder %s183_s8, %s667_s16  ;;  %s672_s4 = sshll.u32 %s771_s30, 4  ;;  %s673_s4 = int_to_ptr.vmem [resolvable:$false] %s672_s4 }
  0x29   : > { %s674_s27 = scalar_lea.vmem %s673_s4, 256  ;;  %p675_p10 = scmp.lt.s32.totalorder %s183_s8, %s673_s4 }
  0x2a   : > { %p670_p4 = pnand %p668_p6, %p628_p2  ;;  %p676_p1 = scmp.lt.s32.totalorder %s674_s27, %s667_s16 }
  0x2c   : > { %p671_p7 = pneg %p670_p4  ;;  %p677_p13 = por %p676_p1, %p675_p10 }
  0x2e   : > { %p678_p3 = pnand %p677_p13, %p671_p7 }
  0x30   : > { %681 = shalt.err (!%p678_p3)
}
  0x31   : > { %548 = dma.hbm_to_vmem [thread:$0]  (!%p867_p0), %s181_s29, 128, %s183_s8, %s170_s15, %s769_s18, %s769_s18, %s770_s19  }
  0x32   : > { %194 = sbr.rel (%p888_p5) target bundleno = 177 (0xb1), region = 28  ;;  %s903_s25 = sand.u32 (!%p888_p5), 1, %s750_s10  }
  0x33   : > { %s527_s26 = sshll.u32 (!%p888_p5), %s903_s25, 3  ;;  %s197_s6 = scalar_lea.sflag (!%p888_p5), [#allocation4], %s903_s25 }
  0x34   : > { %s200_s20 = scalar_lea.vmem (!%p888_p5), [#allocation3], %s527_s26 }
  0x37   : > { %733 = dma.done.wait (%p836_p8), %s197_s6, 128  }
  0x38   : > { %735 = vsyncadd (%p836_p8), %s197_s6, 4294967168  ;;  %s206_s5 = scalar_lea.sflag [#allocation7], %s903_s25  ;;  %s912_s18 = scalar_lea.vmem [#allocation6], %s527_s26 }
  0x39   : > { %737 = dma.done.wait (%p836_p8), %s206_s5, 128  }
  0x3a   : > { %739 = vsyncadd (%p836_p8), %s206_s5, 4294967168  ;;  %v772_v0 = vmov 0.0   ;;  %vm253_vm0 = vcmask 1041408   ;;  %v245_v1 = vld [vmem:[%s200_s20] sm:$0x3]  ;;  %s529_s21 = sshll.u32 %s903_s25, 2 }
  0x3b   : > { %241 = vst [vmem:[#allocation2] sm:$0x3] %v772_v0  ;;  %242 = vst [vmem:[#allocation2 + $0x2] sm:$0x3] %v772_v0  ;;  %v246_v2 = vld [vmem:[%s200_s20 + $0x2] sm:$0x3] }
  0x3c   : > { %243 = vst [vmem:[#allocation2 + $0x4] sm:$0x3] %v772_v0  ;;  %244 = vst [vmem:[#allocation2 + $0x6] sm:$0x3] %v772_v0  ;;  %v247_v3 = vld [vmem:[%s200_s20 + $0x4] sm:$0x3] }
  0x3d   : > { %v248_v4 = vld [vmem:[%s200_s20 + $0x6] sm:$0x3]  ;;  %v254_v5 = vsel %vm253_vm0, %v245_v1, -inf  ;;  %v255_v6 = vsel %vm253_vm0, %v246_v2, -inf  ;;  %v256_v7 = vsel %vm253_vm0, %v247_v3, -inf  ;;  %vm382_vm1 = vcmask 1041409  }
  0x3e   : > { %v257_v8 = vsel %vm253_vm0, %v248_v4, -inf  ;;  %v258_v9 = vmax.f32 %v254_v5, %v255_v6  ;;  %vm384_vm2 = vcmask 1042434   ;;  %s234_s19 = scalar_lea.vmem [#allocation8], %s529_s21  ;;  %s531_s29 = sshll.u32 %s758_s12, 6  ;;  %vm386_vm3 = vcmask 1043459  }
  0x3f   : > { %v259_v10 = vmax.f32 %v256_v7, %v257_v8  ;;  %v251_v7 = vld [vmem:[%s912_s18 + $0x4] sm:$0x3]  ;;  %s405_s28 = sshll.u32 %s234_s19, 4  ;;  %s403_s8 = scalar_lea.hbm %s983_s2, %s531_s29  ;;  %s936_s28 = int_to_ptr.vmem [resolvable:$true] %s405_s28 }
  0x40   : > { %s391_s15 = scalar_lea.sflag [#allocation5], %s903_s25  ;;  %s682_s16 = scalar_lea.vmem %s936_s28, 64 }
  0x41   : > { %v260_v11 = vmax.f32 %v258_v9, %v259_v10  ;;  %p683_p8 = scmp.ne.s32.totalorder %s936_s28, %s682_s16  ;;  %s773_s12 = smov [#allocation8]  }
  0x42   : > { %s686_s30 = sshll.u32 %s773_s12, 4  ;;  %s687_s30 = int_to_ptr.vmem [resolvable:$false] %s686_s30 }
  0x43   : > { %v261_v12 = vsub.f32 %v245_v1, %v260_v11  ;;  %v262_v13 = vsub.f32 %v246_v2, %v260_v11  ;;  %v263_v14 = vsub.f32 %v247_v3, %v260_v11  ;;  %v264_v15 = vsub.f32 %v248_v4, %v260_v11  ;;  %v249_v1 = vld [vmem:[%s912_s18] sm:$0x3]  ;;  %v250_v4 = vld [vmem:[%s912_s18 + $0x2] sm:$0x3]  ;;  %p684_p0 = pnand %p683_p8, %p840_p9  ;;  %s688_s4 = scalar_lea.vmem %s687_s30, 128 }
  0x44   : > { %p689_p5 = scmp.lt.s32.totalorder %s936_s28, %s687_s30  ;;  %p690_p6 = scmp.lt.s32.totalorder %s688_s4, %s682_s16 }
  0x45   : > { %v265_v16 = vmul.f32 1.442695, %v261_v12  ;;  %v267_v17 = vmul.f32 1.442695, %v262_v13  ;;  %v269_v18 = vmul.f32 1.442695, %v263_v14  ;;  %p685_p2 = pneg %p684_p0 }
  0x46   : > { %v271_v19 = vmul.f32 1.442695, %v264_v15  ;;  %p691_p4 = por %p690_p6, %p689_p5 }
  0x47   : > { %606 = vpow2.f32 %v265_v16 }
  0x48   : > { %608 = vpow2.f32 %v267_v17  ;;  %p692_p7 = pnand %p691_p4, %p685_p2 }
  0x49   : > { %610 = vpow2.f32 %v269_v18 }
  0x4a   : > { %612 = vpow2.f32 %v271_v19  ;;  %v333_v19 = vld [vmem:[#allocation2 + $0x4] sm:$0x3] }
  0x54   : > { %v607_v20 = vpop.eup %606 }
  0x55   : > { %v609_v21 = vpop.eup %608  ;;  %v273_v22 = vsel %vm253_vm0, %v607_v20, 0.0 }
  0x56   : > { %v611_v23 = vpop.eup %610  ;;  %v274_v24 = vsel %vm253_vm0, %v609_v21, 0.0 }
  0x57   : > { %v613_v25 = vpop.eup %612  ;;  %v275_v26 = vadd.f32 %v274_v24, %v273_v22  ;;  %v276_v27 = vsel %vm253_vm0, %v611_v23, 0.0 }
  0x58   : > { %v278_v28 = vsel %vm253_vm0, %v613_v25, 0.0 }
  0x59   : > { %v277_v29 = vadd.f32 %v276_v27, %v275_v26  ;;  %v334_v27 = vld [vmem:[#allocation2 + $0x6] sm:$0x3] }
  0x5b   : > { %v279_v30 = vadd.f32 %v278_v28, %v277_v29 }
  0x5d   : > { %614 = vrcp.f32 %v279_v30 }
  0x5e   : > { %616 = vlog2.f32 %v279_v30 }
  0x6a   : > { %v615_v31 = vpop.eup %614 }
  0x6b   : > { %v295_v32 = vmul.f32 %v615_v31, %v607_v20  ;;  %v296_v33 = vmul.f32 %v615_v31, %v609_v21  ;;  %v297_v34 = vmul.f32 %v615_v31, %v611_v23  ;;  %v298_v41 = vmul.f32 %v615_v31, %v613_v25  ;;  %v617_v42 = vpop.eup %616  ;;  %v252_v20 = vld [vmem:[%s912_s18 + $0x6] sm:$0x3] }
  0x6c   : > { %v282_v46 = vmul.f32 0.6931472, %v617_v42 }
  0x6d   : > { %v299_v35 = vmax.f32 %v295_v32, 1e-06  ;;  %v300_v36 = vmax.f32 %v296_v33, 1e-06  ;;  %v301_v37 = vmax.f32 %v297_v34, 1e-06 }
  0x6e   : > { %v302_v47 = vmax.f32 %v298_v41, 1e-06  ;;  %v283_v49 = vsub.f32 %v261_v12, %v282_v46  ;;  %v284_v51 = vsub.f32 %v262_v13, %v282_v46  ;;  %v285_v52 = vsub.f32 %v263_v14, %v282_v46  ;;  %v331_v12 = vld [vmem:[#allocation2] sm:$0x3] }
  0x6f   : > { %v303_v38 = vmin.f32 %v299_v35, 0.999999  ;;  %v304_v39 = vmin.f32 %v300_v36, 0.999999  ;;  %v305_v40 = vmin.f32 %v301_v37, 0.999999  ;;  %v286_v56 = vsub.f32 %v264_v15, %v282_v46 }
  0x70   : > { %v306_v48 = vmin.f32 %v302_v47, 0.999999  ;;  %v287_v53 = vmax.f32 %v283_v49, -13.815511  ;;  %v288_v54 = vmax.f32 %v284_v51, -13.815511 }
  0x71   : > { %v307_v43 = vsub.f32 1.0, %v303_v38  ;;  %v308_v44 = vsub.f32 1.0, %v304_v39  ;;  %v309_v45 = vsub.f32 1.0, %v305_v40  ;;  %v289_v55 = vmax.f32 %v285_v52, -13.815511 }
  0x72   : > { %v310_v50 = vsub.f32 1.0, %v306_v48  ;;  %v291_v57 = vmin.f32 %v287_v53, -1.0000005e-06  ;;  %v292_v59 = vmin.f32 %v288_v54, -1.0000005e-06 }
  0x73   : > { %618 = vlog2.f32 %v307_v43  ;;  %v293_v62 = vmin.f32 %v289_v55, -1.0000005e-06  ;;  %v290_v63 = vmax.f32 %v286_v56, -13.815511  ;;  %v332_v15 = vld [vmem:[#allocation2 + $0x2] sm:$0x3] }
  0x74   : > { %620 = vlog2.f32 %v308_v44 }
  0x75   : > { %622 = vlog2.f32 %v309_v45  ;;  %v294_v10 = vmin.f32 %v290_v63, -1.0000005e-06 }
  0x76   : > { %624 = vlog2.f32 %v310_v50 }
  0x80   : > { %v619_v58 = vpop.eup %618 }
  0x81   : > { %v621_v60 = vpop.eup %620  ;;  %v312_v61 = vmul.f32 0.6931472, %v619_v58 }
  0x82   : > { %v623_v0 = vpop.eup %622  ;;  %v314_v2 = vmul.f32 0.6931472, %v621_v60 }
  0x83   : > { %v319_v3 = vsub.f32 %v291_v57, %v312_v61  ;;  %v316_v5 = vmul.f32 0.6931472, %v623_v0  ;;  %v625_v11 = vpop.eup %624 }
  0x84   : > { %v320_v6 = vsub.f32 %v292_v59, %v314_v2  ;;  %v318_v17 = vmul.f32 0.6931472, %v625_v11 }
  0x85   : > { %v323_v8 = vmul.f32 %v319_v3, %v249_v1  ;;  %v321_v9 = vsub.f32 %v293_v62, %v316_v5 }
  0x86   : > { %v324_v13 = vmul.f32 %v320_v6, %v250_v4  ;;  %v322_v23 = vsub.f32 %v294_v10, %v318_v17 }
  0x87   : > { %v327_v14 = vadd.f32 %v323_v8, %v312_v61  ;;  %v325_v16 = vmul.f32 %v321_v9, %v251_v7 }
  0x88   : > { %v328_v18 = vadd.f32 %v324_v13, %v314_v2  ;;  %v326_v26 = vmul.f32 %v322_v23, %v252_v20 }
  0x89   : > { %v335_v21 = vadd.f32 %v331_v12, %v327_v14  ;;  %v329_v22 = vadd.f32 %v325_v16, %v316_v5 }
  0x8a   : > { %v336_v24 = vadd.f32 %v332_v15, %v328_v18  ;;  %v330_v28 = vadd.f32 %v326_v26, %v318_v17 }
  0x8b   : > { %339 = vst [vmem:[#allocation2] sm:$0x3] %v335_v21  ;;  %v337_v25 = vadd.f32 %v333_v19, %v329_v22 }
  0x8c   : > { %340 = vst [vmem:[#allocation2 + $0x2] sm:$0x3] %v336_v24  ;;  %v338_v29 = vadd.f32 %v334_v27, %v330_v28 }
  0x8d   : > { %341 = vst [vmem:[#allocation2 + $0x4] sm:$0x3] %v337_v25 }
  0x8e   : > { %342 = vst [vmem:[#allocation2 + $0x6] sm:$0x3] %v338_v29 }
  0x92   : > { %v346_v30 = vld [vmem:[#allocation2] sm:$0x3] }
  0x93   : > { %v347_v31 = vld [vmem:[#allocation2 + $0x2] sm:$0x3]  ;;  %v350_v32 = vsel %vm253_vm0, %v346_v30, 0.0 }
  0x94   : > { %v348_v33 = vld [vmem:[#allocation2 + $0x4] sm:$0x3]  ;;  %v351_v34 = vrot.slane %v350_v32, 4  ;;  %v357_v35 = vsel %vm253_vm0, %v347_v31, 0.0 }
  0x95   : > { %v358_v36 = vrot.slane %v357_v35, 4  ;;  %v364_v37 = vsel %vm253_vm0, %v348_v33, 0.0  ;;  %v349_v41 = vld [vmem:[#allocation2 + $0x6] sm:$0x3] }
  0x96   : > { %v352_v38 = vadd.f32 %v351_v34, %v350_v32  ;;  %v365_v39 = vrot.slane %v364_v37, 4  ;;  %v371_v45 = vsel %vm253_vm0, %v349_v41, 0.0 }
  0x97   : > { %v359_v40 = vadd.f32 %v358_v36, %v357_v35  ;;  %v372_v48 = vrot.slane %v371_v45, 4 }
  0x98   : > { %v353_v42 = vrot.slane %v352_v38, 2  ;;  %v366_v43 = vadd.f32 %v365_v39, %v364_v37 }
  0x99   : > { %v360_v44 = vrot.slane %v359_v40, 2  ;;  %v373_v52 = vadd.f32 %v372_v48, %v371_v45 }
  0x9a   : > { %v354_v46 = vadd.f32 %v353_v42, %v352_v38  ;;  %v367_v47 = vrot.slane %v366_v43, 2 }
  0x9b   : > { %v361_v49 = vadd.f32 %v360_v44, %v359_v40  ;;  %v374_v56 = vrot.slane %v373_v52, 2 }
  0x9c   : > { %v355_v50 = vrot.slane %v354_v46, 1  ;;  %v368_v51 = vadd.f32 %v367_v47, %v366_v43 }
  0x9d   : > { %v362_v53 = vrot.slane %v361_v49, 1  ;;  %v375_v59 = vadd.f32 %v374_v56, %v373_v52 }
  0x9e   : > { %v356_v54 = vadd.f32 %v355_v50, %v354_v46  ;;  %v369_v55 = vrot.slane %v368_v51, 1 }
  0x9f   : > { %v363_v57 = vadd.f32 %v362_v53, %v361_v49  ;;  %v376_v61 = vrot.slane %v375_v59, 1 }
  0xa0   : > { %v370_v58 = vadd.f32 %v369_v55, %v368_v51 }
  0xa1   : > { %v383_v60 = vsel %vm382_vm1, %v363_v57, %v356_v54  ;;  %v377_v63 = vadd.f32 %v376_v61, %v375_v59 }
  0xa2   : > { %v385_v62 = vsel %vm384_vm2, %v370_v58, %v383_v60 }
  0xa3   : > { %v387_v0 = vsel %vm386_vm3, %v377_v63, %v385_v62 }
  0xa4   : > { %389 = vst [vmem:[%s234_s19] sm:$0xf] %v387_v0 }
  0xa5   : > { %695 = shalt.err (!%p692_p7)
}
  0xa6   : > { %s696_s27 = scalar_lea.hbm %s403_s8, 64  ;;  %s700_s6 = scalar_lea.hbm %s983_s2, 128 }
  0xa7   : > { %p697_p10 = scmp.ne.s32.totalorder %s403_s8, %s696_s27  ;;  %p701_p3 = scmp.lt.s32.totalorder %s403_s8, %s983_s2 }
  0xa8   : > { %p702_p8 = scmp.lt.s32.totalorder %s700_s6, %s696_s27 }
  0xa9   : > { %p698_p1 = pnand %p697_p10, %p840_p9 }
  0xaa   : > { %p703_p0 = por %p702_p8, %p701_p3 }
  0xab   : > { %p699_p13 = pneg %p698_p1 }
  0xad   : > { %p704_p12 = pnand %p703_p0, %p699_p13 }
  0xaf   : > { %707 = shalt.err (!%p704_p12)
}
  0xb0   : > { %540 = dma.vmem_to_hbm [thread:$0]  (%p840_p9), %s936_s28, 64, %s403_s8, %s391_s15  }
  0xb1 PF: > { %s417_s18 = sand.u32 1, %s746_s9   ;;  %p990_p2 = scmp.ge.s32.totalorder %s766_s14, 2 }
  0xb2   : > { %s418_s21 = scalar_lea.sflag [#allocation5], %s417_s18 }
  0xb3   : > { %p550_p5 = pnand %p990_p2, %p847_p11 }
  0xb5   : > { %p551_p6 = pneg %p550_p5 }
  0xb7   : > { %741 = dma.done.wait (%p551_p6), %s418_s21, 64  }
  0xb8   : > { %743 = vsyncadd (%p551_p6), %s418_s21, 4294967232  ;;  %s21_s14 = sadd.s32 1, %s766_s14   ;;  %s991_s9 = smov %s750_s10 }
  0xb9   : > { %p18_p4 = scmp.ge.s32.totalorder %s21_s14, 4   ;;  %s992_s10 = smov %s754_s11 }
  0xba   : > { %s993_s11 = smov %s845_s23  ;;  %s994_s12 = smov %s762_s13 }
  0xbb   : > { %s995_s13 = smov %s997_s17  ;;  %20 = sbr.rel (!%p18_p4) target bundleno = 8 (0x8), region = 94 }
  0xc0   :  { %423 = vsyncpa [#allocation4], 1 }
  0xc1   :  { %425 = vsyncpa [#allocation4 + $0x1], 1 }
  0xc2   :  { %426 = vsyncpa [#allocation7], 1 }
  0xc3   :  { %428 = vsyncpa [#allocation7 + $0x1], 1 }
  0xc4   :  { %429 = vsyncpa [#allocation5], 1 }
  0xc5   :  { %431 = vsyncpa [#allocation5 + $0x1], 1 }

</bundles_post_ra>
